<compile_context>
chip_gen: v6e
topology: v6e:2x2x1
jax: 0.10.0
libtpu: 0.0.40
codegen_flags: <defaults>
</compile_context>

<pallas_src>
import math

import jax
import jax.numpy as jnp
from jax.experimental import pallas as pl
from jax.experimental.pallas import tpu as pltpu


def _rel_pos_gather_kernel(sel_ref, rk_ref, rv_ref, k_ref, v_ref):
    # sel_ref : (T, f*V)      int32  == 0 exactly where the one-hot is 1
    # rk_ref  : (f*V, f*H*D)  f32    block-diag, pre-scaled, head-replicated k table
    # rv_ref  : (f*V, f*H*D)  f32    same for the v half
    # k_ref   : (T, f*H*D)    f32    lane-dense k output rows
    # v_ref   : (T, f*H*D)    f32    lane-dense v output rows
    onehot = (sel_ref[...] == 0).astype(jnp.float32)          # one VPU pass
    k_ref[...] = jnp.dot(onehot, rk_ref[...],
                         preferred_element_type=jnp.float32,
                         precision=jax.lax.Precision.HIGHEST)
    v_ref[...] = jnp.dot(onehot, rv_ref[...],
                         preferred_element_type=jnp.float32,
                         precision=jax.lax.Precision.HIGHEST)


def _vmem_limit_bytes():
    try:
        cap = int(pltpu.get_tpu_info().vmem_capacity_bytes)
    except Exception:
        cap = 64 * 1024 * 1024          # conservative: v7x physical VMEM
    # ~48 MiB usable on v7x (64 MiB physical), up to 96 MiB on v5e/v6e (128 MiB).
    return int(min(cap * 3 // 4, 96 * 1024 * 1024))


def _pick_row_tile(n_out_rows, out_lanes, vmem_limit_bytes):
    """Output-row tile: VMEM-budgeted, multiple of 8, no divisibility requirement."""
    # Resident per output row: k & v outputs, double-buffered, f32 + small temps.
    per_row = (2 * 2 + 1) * out_lanes * 4 + 1024
    tile = (vmem_limit_bytes // 2) // per_row
    # >= 8 grid steps (>= 4 per v7x TensorCore) when there is enough work, but keep
    # tiles >= 512 rows so DMA stays near the HBM roofline; ragged tail is masked.
    tile = min(tile, max(512, -(-n_out_rows // 8)))
    tile = max(8, (tile // 8) * 8)
    if n_out_rows <= tile:
        return n_out_rows
    return tile


def relative_position_embedding(inputs, parent_emb, brother_emb, relation_type,
                                d_model, num_heads):
    """Forward pass of RelativePositionEmbedding (dropout p=0.0 => identity).

    inputs:      [B, M, M] int relative-position ids
    parent_emb / brother_emb: [2k+2, 2*d_model] float32 embedding tables
    returns:     (k_emb, v_emb), each [B*num_heads, M, M, d_model]
    """
    emb_table = parent_emb if relation_type == 'parent' else brother_emb

    B, M, _ = inputs.shape
    D, H = d_model, num_heads
    hd = H * D
    n_src = B * M * M
    V = emb_table.shape[0]

    # --- hoisted table prep (tiny, done once per call, outside the grid loop) ---
    tab = emb_table.astype(jnp.float32) * math.sqrt(d_model)   # scale folded here
    tab_k = jnp.tile(tab[:, :D], (1, H))                       # (V, H*D)
    tab_v = jnp.tile(tab[:, D:], (1, H))                       # (V, H*D)

    # Fold f source rows per output row so the store lane width is a 128-multiple.
    f = 128 // math.gcd(hd, 128)
    if f > 16 or n_src % f != 0:
        f = 1      # fallback: masked stores, still correct
    n_out = n_src // f
    out_lanes = f * hd
    in_lanes = f * V

    # Block-diagonal RHS: one one-hot matmul emits the folded, head-replicated row.
    eye_f = jnp.eye(f, dtype=jnp.float32)
    rhs_k = jnp.kron(eye_f, tab_k)                              # (f*V, f*H*D)
    rhs_v = jnp.kron(eye_f, tab_v)

    # sel[t, p*V + v] == 0  <=>  ids_flat[t*f + p] == v   (one-hot test in-kernel)
    ids = inputs.reshape(n_out, f).astype(jnp.int32)
    col = jnp.arange(in_lanes, dtype=jnp.int32) % V
    sel = jnp.repeat(ids, V, axis=1) - col[None, :]

    vmem_limit = _vmem_limit_bytes()
    tile = _pick_row_tile(n_out, out_lanes, vmem_limit)
    grid = (pl.cdiv(n_out, tile),)

    k_flat, v_flat = pl.pallas_call(
        _rel_pos_gather_kernel,
        out_shape=(jax.ShapeDtypeStruct((n_out, out_lanes), jnp.float32),
                   jax.ShapeDtypeStruct((n_out, out_lanes), jnp.float32)),
        grid_spec=pltpu.PrefetchScalarGridSpec(
            num_scalar_prefetch=0,
            grid=grid,
            in_specs=[
                pl.BlockSpec((tile, in_lanes), lambda i: (i, 0)),
                pl.BlockSpec((in_lanes, out_lanes), lambda i: (0, 0)),
                pl.BlockSpec((in_lanes, out_lanes), lambda i: (0, 0)),
            ],
            out_specs=[
                pl.BlockSpec((tile, out_lanes), lambda i: (i, 0)),
                pl.BlockSpec((tile, out_lanes), lambda i: (i, 0)),
            ],
        ),
        compiler_params=pltpu.CompilerParams(
            dimension_semantics=("parallel",),
            vmem_limit_bytes=vmem_limit),
    )(sel, rhs_k, rhs_v)

    # Row-major reinterpretation == PyTorch's repeat(1,1,1,H).view(-1,M,M,D).
    k_emb = k_flat.reshape(B * H, M, M, D)
    v_emb = v_flat.reshape(B * H, M, M, D)
    return k_emb, v_emb


if __name__ == "__main__":
    d_model, k, num_heads = 32, 3, 2
    B, M = 2, 8
    vocab = 2 * k + 2

    key = jax.random.PRNGKey(0)
    kp, kb, ki = jax.random.split(key, 3)

    # Deterministic parameter init (nn.Embedding ~ N(0,1), padding_idx=1 row zeroed).
    parent_emb = jax.random.normal(kp, (vocab, 2 * d_model), jnp.float32).at[1].set(0.0)
    brother_emb = jax.random.normal(kb, (vocab, 2 * d_model), jnp.float32).at[1].set(0.0)

    inputs = jax.random.randint(ki, (B, M, M), 0, vocab, jnp.int32)

    k_emb, v_emb = relative_position_embedding(
        inputs, parent_emb, brother_emb, 'parent', d_model, num_heads)
    jax.block_until_ready((k_emb, v_emb))

    # Pure-JAX reference check of the forward semantics.
    scale = math.sqrt(d_model)
    emb = parent_emb[inputs]                                   # (B, M, M, 2*D)
    ke_ref = jnp.tile(emb[..., :d_model], (1, 1, 1, num_heads)).reshape(
        -1, M, M, d_model) * scale
    ve_ref = jnp.tile(emb[..., d_model:], (1, 1, 1, num_heads)).reshape(
        -1, M, M, d_model) * scale

    assert k_emb.shape == (B * num_heads, M, M, d_model)
    assert v_emb.shape == (B * num_heads, M, M, d_model)
    assert jnp.allclose(k_emb, ke_ref, atol=1e-4, rtol=1e-4)
    assert jnp.allclose(v_emb, ve_ref, atol=1e-4, rtol=1e-4)

    print("KERNEL_OK")
</pallas_src>

<mosaic_0001>
module attributes {stable_mosaic.version = 11 : i64} {
  func.func @_rel_pos_gather_kernel(%arg0: i32, %arg1: memref<64x16xi32, #tpu.memory_space<vmem>>, %arg2: memref<16x128xf32, #tpu.memory_space<vmem>>, %arg3: memref<16x128xf32, #tpu.memory_space<vmem>>, %arg4: memref<64x128xf32, #tpu.memory_space<vmem>>, %arg5: memref<64x128xf32, #tpu.memory_space<vmem>>) attributes {dimension_semantics = [#tpu.dimension_semantics<parallel>], iteration_bounds = array<i64: 1>, scalar_prefetch = 0 : i64, scratch_operands = 0 : i64, tpu.core_type = #tpu.core_type<tc>, window_params = [{transform_indices = @transform_0, window_bounds = array<i64: 64, 16>}, {pipeline_mode = #tpu.pipeline_mode<synchronous>, transform_indices = @transform_1, window_bounds = array<i64: 16, 128>}, {pipeline_mode = #tpu.pipeline_mode<synchronous>, transform_indices = @transform_2, window_bounds = array<i64: 16, 128>}, {transform_indices = @transform_3, window_bounds = array<i64: 64, 128>}, {transform_indices = @transform_4, window_bounds = array<i64: 64, 128>}]} {
    %c0 = arith.constant 0 : index
    %c0_0 = arith.constant 0 : index
    %0 = vector.load %arg1[%c0, %c0_0] : memref<64x16xi32, #tpu.memory_space<vmem>>, vector<64x16xi32>
    %c0_i32 = arith.constant 0 : i32
    %1 = vector.broadcast %c0_i32 : i32 to vector<64x16xi32>
    %2 = arith.cmpi eq, %0, %1 : vector<64x16xi32>
    %3 = arith.extui %2 : vector<64x16xi1> to vector<64x16xi32>
    %4 = arith.sitofp %3 : vector<64x16xi32> to vector<64x16xf32>
    %c0_1 = arith.constant 0 : index
    %c0_2 = arith.constant 0 : index
    %5 = vector.load %arg2[%c0_1, %c0_2] : memref<16x128xf32, #tpu.memory_space<vmem>>, vector<16x128xf32>
    %cst = arith.constant dense<0.000000e+00> : vector<64x128xf32>
    %6 = tpu.matmul %4, %5, %cst {dimension_numbers = #tpu.dot_dimension_numbers<[1], [0], [0], [1], [0, 0, 1, 1], [], []>, precision = #tpu.contract_precision<fp32>} : vector<64x16xf32>, vector<16x128xf32>, vector<64x128xf32> -> vector<64x128xf32>
    %c0_3 = arith.constant 0 : index
    %c0_4 = arith.constant 0 : index
    %7 = vector.load %arg4[%c0_3, %c0_4] : memref<64x128xf32, #tpu.memory_space<vmem>>, vector<64x128xf32>
    tpu.vector_store %arg4[%c0_3, %c0_4], %6 {strides = array<i32>} : memref<64x128xf32, #tpu.memory_space<vmem>>, vector<64x128xf32>,
    %c0_5 = arith.constant 0 : index
    %c0_6 = arith.constant 0 : index
    %8 = vector.load %arg3[%c0_5, %c0_6] : memref<16x128xf32, #tpu.memory_space<vmem>>, vector<16x128xf32>
    %cst_7 = arith.constant dense<0.000000e+00> : vector<64x128xf32>
    %9 = tpu.matmul %4, %8, %cst_7 {dimension_numbers = #tpu.dot_dimension_numbers<[1], [0], [0], [1], [0, 0, 1, 1], [], []>, precision = #tpu.contract_precision<fp32>} : vector<64x16xf32>, vector<16x128xf32>, vector<64x128xf32> -> vector<64x128xf32>
    %c0_8 = arith.constant 0 : index
    %c0_9 = arith.constant 0 : index
    %10 = vector.load %arg5[%c0_8, %c0_9] : memref<64x128xf32, #tpu.memory_space<vmem>>, vector<64x128xf32>
    tpu.vector_store %arg5[%c0_8, %c0_9], %9 {strides = array<i32>} : memref<64x128xf32, #tpu.memory_space<vmem>>, vector<64x128xf32>,
    return
  }
  func.func @transform_0(%arg0: i32) -> (i32, i32) {
    %c0_i32 = arith.constant 0 : i32
    %c0_i32_0 = arith.constant 0 : i32
    return %arg0, %c0_i32 : i32, i32
  }
  func.func @transform_1(%arg0: i32) -> (i32, i32) {
    %c0_i32 = arith.constant 0 : i32
    %c0_i32_0 = arith.constant 0 : i32
    %c0_i32_1 = arith.constant 0 : i32
    return %c0_i32, %c0_i32_0 : i32, i32
  }
  func.func @transform_2(%arg0: i32) -> (i32, i32) {
    %c0_i32 = arith.constant 0 : i32
    %c0_i32_0 = arith.constant 0 : i32
    %c0_i32_1 = arith.constant 0 : i32
    return %c0_i32, %c0_i32_0 : i32, i32
  }
  func.func @transform_3(%arg0: i32) -> (i32, i32) {
    %c0_i32 = arith.constant 0 : i32
    %c0_i32_0 = arith.constant 0 : i32
    return %arg0, %c0_i32 : i32, i32
  }
  func.func @transform_4(%arg0: i32) -> (i32, i32) {
    %c0_i32 = arith.constant 0 : i32
    %c0_i32_0 = arith.constant 0 : i32
    return %arg0, %c0_i32 : i32, i32
  }
}

</mosaic_0001>

<bundles_post_ra>
// kernel: tpu_custom_call.1
= control target key start
LH: loop header
LB: loop body
LE: loop exit
PB: predicated region body
PF: predicated region fallthrough
CT: control target
= control target key end

     0   :  { %10 = vsyncpa [#allocation3], 0  ;;  %vm52_vm0 = vcmask 130048   ;;  %v2064_v8 = vmov 0.0   ;;  %s2466_s0 = inlined_call_operand.vmem [shape: s32[64,16], index: 0, kind: input, shape index: {}]   ;;  %s2467_s1 = inlined_call_operand.vmem [shape: f32[16,128], index: 1, kind: input, shape index: {}]   ;;  %s2468_s2 = inlined_call_operand.vmem [shape: f32[16,128], index: 2, kind: input, shape index: {}]   ;;  %s2469_s3 = inlined_call_operand.hbm [shape: f32[64,128], index: 3, kind: output, shape index: {0}]   ;;  %s2470_s4 = inlined_call_operand.hbm [shape: f32[64,128], index: 4, kind: output, shape index: {1}]  }
   0x1   :  { %v51_v0 = vld [vmem:[%s2467_s1 + $0x8] sm:$0xff]  ;;  %v50_v1 = vld [vmem:[%s2467_s1] sm:$0xff]  ;;  %v20_v6 = vld [vmem:[%s2466_s0 + $0x10] sm:$0xff] }
   0x2   :  { %v18_v2 = vld [vmem:[%s2466_s0] sm:$0xff]  ;;  %v2103_v3 = vand.u32 4294901760, %v51_v0  ;;  %v2105_v4 = vand.u32 4294901760, %v50_v1  ;;  %v19_v5 = vld [vmem:[%s2466_s0 + $0x8] sm:$0xff]  ;;  %v21_v7 = vld [vmem:[%s2466_s0 + $0x18] sm:$0xff]  ;;  %vm28_vm3 = vcmp.eq.s32.totalorder %v20_v6, 0 }
   0x3   :  { %vm26_vm1 = vcmp.eq.s32.totalorder %v18_v2, 0  ;;  %vm27_vm2 = vcmp.eq.s32.totalorder %v19_v5, 0  ;;  %vm29_vm4 = vcmp.eq.s32.totalorder %v21_v7, 0  ;;  %v22_v14 = vld [vmem:[%s2466_s0 + $0x20] sm:$0xff]  ;;  %v2140_v17 = vsel %vm28_vm3, 1.0, %v2064_v8 }
   0x4   :  { %v2117_v9 = vsel %vm26_vm1, 1.0, %v2064_v8  ;;  %1823 = vmatprep.subr.mxu0 %v2103_v3  ;;  %v254_v10 = vsub.f32 %v51_v0, %v2103_v3  ;;  %v2124_v12 = vsel %vm27_vm2, 1.0, %v2064_v8  ;;  %v2127_v13 = vsub.f32 %v50_v1, %v2105_v4 }
   0x5   :  { %v54_v11 = vsel %vm52_vm0, %v2117_v9, 0  ;;  %1843 = vmatprep.mubr.msk.f32.mxu1 %vm52_vm0, %v2117_v9  ;;  %1824 = vmatpush3.msra.mxu0 %v2103_v3  ;;  %v57_v16 = vsel %vm52_vm0, %v2124_v12, 0  ;;  %v2143_v18 = vsel %vm29_vm4, 1.0, %v2064_v8 }
   0x6   :  { %v2135_v15 = vsub.f32 %v54_v11, %v54_v11 }
   0x7   :  { %11 = vsyncpa [#allocation5], 0  ;;  %1825 = vmatprep.subr.mxu0 %v2105_v4  ;;  %v2146_v19 = vand.u32 4294901760, %v254_v10  ;;  %v2148_v20 = vsub.f32 %v57_v16, %v57_v16  ;;  %v2151_v21 = vand.u32 4294901760, %v2127_v13  ;;  %v60_v22 = vsel %vm52_vm0, %v2140_v17, 0  ;;  %v23_v23 = vld [vmem:[%s2466_s0 + $0x28] sm:$0xff] }
   0x8   :  { %1826 = vmatpush3.msra.mxu0 %v2105_v4  ;;  %v2160_v24 = vand.u32 4294901760, %v2135_v15  ;;  %v2162_v25 = vsub.f32 %v60_v22, %v60_v22  ;;  %v63_v26 = vsel %vm52_vm0, %v2143_v18, 0  ;;  %vm30_vm5 = vcmp.eq.s32.totalorder %v22_v14, 0  ;;  %v24_v38 = vld [vmem:[%s2466_s0 + $0x30] sm:$0xff]  ;;  %v25_v39 = vld [vmem:[%s2466_s0 + $0x38] sm:$0xff]  ;;  %v846_v57 = vld [vmem:[%s2468_s2 + $0x8] sm:$0xff] }
   0x9   :  { %v256_v27 = vsub.f32 %v254_v10, %v2146_v19  ;;  %v2168_v28 = vand.u32 4294901760, %v2148_v20  ;;  %v263_v29 = vsub.f32 %v2127_v13, %v2151_v21  ;;  %1855 = vmatprep.subr.mxu0 %v254_v10  ;;  %v2172_v30 = vsub.f32 %v63_v26, %v63_v26 }
   0xa   :  { %v147_v31 = vsub.f32 %v2135_v15, %v2160_v24  ;;  %v2177_v32 = vand.u32 4294901760, %v2162_v25  ;;  %v2180_v33 = vsel %vm30_vm5, 1.0, %v2064_v8  ;;  %vm31_vm6 = vcmp.eq.s32.totalorder %v23_v23, 0 }
   0xb   :  { %v257_v34 = vand.u32 4294901760, %v256_v27  ;;  %v157_v35 = vsub.f32 %v2148_v20, %v2168_v28  ;;  %v264_v36 = vand.u32 4294901760, %v263_v29  ;;  %v2185_v37 = vand.u32 4294901760, %v2172_v30 }
   0xc   :  { %v2193_v40 = vand.u32 4294901760, %v147_v31  ;;  %v167_v41 = vsub.f32 %v2162_v25, %v2177_v32  ;;  %v66_v42 = vsel %vm52_vm0, %v2180_v33, 0  ;;  %v2200_v43 = vsel %vm31_vm6, 1.0, %v2064_v8 }
   0xd   :  { %1839 = vmatprep.subr.mxu1 %v257_v34  ;;  %v2202_v44 = vand.u32 4294901760, %v157_v35  ;;  %v177_v45 = vsub.f32 %v2172_v30, %v2185_v37  ;;  %v2206_v46 = vsub.f32 %v66_v42, %v66_v42  ;;  %v69_v47 = vsel %vm52_vm0, %v2200_v43, 0 }
   0xe   :  { %1827 = vmatprep.mubr.f32.mxu0 %v2193_v40  ;;  %1840 = vmatpush3.msra.mxu1 %v257_v34  ;;  %v2211_v48 = vand.u32 4294901760, %v167_v41  ;;  %v2213_v49 = vsub.f32 %v69_v47, %v69_v47  ;;  %vm32_vm7 = vcmp.eq.s32.totalorder %v24_v38, 0  ;;  %vm33_vm8 = vcmp.eq.s32.totalorder %v25_v39, 0 }
   0xf   :  { %1828 = vmatmul.mubr.f32.vlgmr.msra.gmra.mxu0 %v2202_v44  ;;  %1841 = vmatprep.subr.mxu1 %v264_v36  ;;  %v2216_v50 = vand.u32 4294901760, %v177_v45  ;;  %v2219_v51 = vand.u32 4294901760, %v2206_v46  ;;  %v2222_v52 = vsel %vm32_vm7, 1.0, %v2064_v8  ;;  %v2225_v53 = vsel %vm33_vm8, 1.0, %v2064_v8 }
  0x10   :  { %1842 = vmatpush3.msra.mxu1 %v264_v36  ;;  %1856 = vmatpush3.msra.mxu0 %v254_v10  ;;  %v2228_v54 = vand.u32 4294901760, %v2213_v49  ;;  %v72_v55 = vsel %vm52_vm0, %v2222_v52, 0  ;;  %v75_v56 = vsel %vm52_vm0, %v2225_v53, 0  ;;  %v2261_v1 = vand.u32 4294901760, %v846_v57 }
  0x11   :  { %1844 = vmatmul.mubr.msk.f32.vlgmr.msra.gmra.mxu1 %vm52_vm0, %v2124_v12  ;;  %1871 = vmatprep.subr.mxu1 %v2103_v3  ;;  %v187_v58 = vsub.f32 %v2206_v46, %v2219_v51  ;;  %v2242_v59 = vsub.f32 %v72_v55, %v72_v55  ;;  %v2244_v60 = vsub.f32 %v75_v56, %v75_v56 }
  0x12   :  { %1830 = vmatprep.mubr.f32.mxu0 %v2211_v48  ;;  %1872 = vmatpush3.msra.mxu1 %v2103_v3  ;;  %v197_v61 = vsub.f32 %v2213_v49, %v2228_v54  ;;  %v2284_v10 = vsub.f32 %v846_v57, %v2261_v1 }
  0x13   :  { %1831 = vmatmul.mubr.f32.gmra.mxu0 %v2216_v50  ;;  %1846 = vmatprep.mubr.msk.f32.mxu1 %vm52_vm0, %v2140_v17  ;;  %v2253_v62 = vand.u32 4294901760, %v187_v58  ;;  %v2256_v63 = vand.u32 4294901760, %v2242_v59  ;;  %v2259_v0 = vand.u32 4294901760, %v2244_v60 }
  0x14   :  { %v2263_v2 = vand.u32 4294901760, %v197_v61  ;;  %1857 = vmatprep.subr.mxu0 %v2127_v13  ;;  %1873 = vmatprep.subr.mxu1 %v2105_v4  ;;  %v2295_v11 = vand.u32 4294901760, %v2284_v10 }
  0x15   :  { %1847 = vmatmul.mubr.msk.f32.gmra.mxu1 %vm52_vm0, %v2143_v18  ;;  %1833 = vmatprep.mubr.f32.mxu0 %v2253_v62  ;;  %v207_v5 = vsub.f32 %v2242_v59, %v2256_v63  ;;  %v217_v6 = vsub.f32 %v2244_v60, %v2259_v0 }
  0x16   :  { %1849 = vmatprep.mubr.msk.f32.mxu1 %vm52_vm0, %v2180_v33  ;;  %1858 = vmatpush3.msra.mxu0 %v2127_v13  ;;  %v845_v13 = vld [vmem:[%s2468_s2] sm:$0xff]  ;;  %v1026_v14 = vsub.f32 %v2284_v10, %v2295_v11  ;;  %s2065_s2 = smov [#allocation2]  }
  0x17   :  { %1834 = vmatmul.mubr.f32.gmra.mxu0 %v2263_v2  ;;  %v2278_v7 = vand.u32 4294901760, %v207_v5  ;;  %1874 = vmatpush3.msra.mxu1 %v2105_v4  ;;  %v2281_v8 = vand.u32 4294901760, %v217_v6  ;;  %v2307_v16 = vand.u32 4294901760, %v845_v13  ;;  %s1620_s11 = sshll.u32 %s2065_s2, 4  ;;  %s1621_s11 = int_to_ptr.vmem [resolvable:$true] %s1620_s11 }
  0x18   :  { %1887 = vmatprep.subr.mxu0 %v2146_v19  ;;  %1903 = vmatprep.subr.mxu1 %v2103_v3  ;;  %v1027_v22 = vand.u32 4294901760, %v1026_v14  ;;  %s2020_s12 = scalar_lea.vmem %s1621_s11, 1024  ;;  %p2025_p1 = scmp.lt.s32.totalorder %s1621_s11, %s1621_s11 }
  0x19   :  { %1850 = vmatmul.mubr.msk.f32.gmra.mxu1 %vm52_vm0, %v2200_v43  ;;  %1836 = vmatprep.mubr.f32.mxu0 %v2278_v7  ;;  %v1031_v23 = vsub.f32 %v845_v13, %v2307_v16  ;;  %p2021_p0 = scmp.ne.s32.totalorder %s1621_s11, %s2020_s12  ;;  %p2026_p2 = scmp.lt.s32.totalorder %s2020_s12, %s2020_s12 }
  0x1a   :  { %1852 = vmatprep.mubr.msk.f32.mxu1 %vm52_vm0, %v2222_v52 }
  0x1b   :  { %1837 = vmatmul.mubr.f32.gmra.mxu0 %v2281_v8  ;;  %p2027_p3 = por %p2026_p2, %p2025_p1 }
  0x1c   :  { %1859 = vmatprep.mubr.f32.mxu0 %v2135_v15 }
  0x1d   :  { %1853 = vmatmul.mubr.msk.f32.gmra.mxu1 %vm52_vm0, %v2225_v53  ;;  %p2028_p4 = pnand %p2027_p3, %p2021_p0 }
  0x1e   :  { %1875 = vmatprep.mubr.f32.mxu1 %v2160_v24 }
  0x1f   :  { %1860 = vmatmul.mubr.f32.vlgmr.msra.gmra.mxu0 %v2148_v20 }
  0x20   :  { %1888 = vmatpush3.msra.mxu0 %v2146_v19  ;;  %1862 = vmatprep.mubr.f32.mxu0 %v2162_v25 }
  0x21   :  { %1876 = vmatmul.mubr.f32.vlgmr.msra.gmra.mxu1 %v2168_v28  ;;  %1889 = vmatprep.subr.mxu0 %v2151_v21 }
  0x22   :  { %1904 = vmatpush3.msra.mxu1 %v2103_v3  ;;  %1878 = vmatprep.mubr.f32.mxu1 %v2177_v32  ;;  %v2325_v3 = vand.u32 4294901760, %v1031_v23 }
  0x23   :  { %1863 = vmatmul.mubr.f32.gmra.mxu0 %v2172_v30  ;;  %1905 = vmatprep.subr.mxu1 %v2105_v4 }
  0x24   :  { %1865 = vmatprep.mubr.f32.mxu0 %v2206_v46  ;;  %1890 = vmatpush3.msra.mxu0 %v2151_v21  ;;  %v1033_v19 = vsub.f32 %v1031_v23, %v2325_v3 }
  0x25   :  { %1879 = vmatmul.mubr.f32.gmra.mxu1 %v2185_v37  ;;  %1919 = vmatprep.subr.mxu0 %v2261_v1 }
  0x26   :  { %1881 = vmatprep.mubr.f32.mxu1 %v2219_v51  ;;  %1906 = vmatpush3.msra.mxu1 %v2105_v4  ;;  %v1034_v4 = vand.u32 4294901760, %v1033_v19 }
  0x27   :  { %1866 = vmatmul.mubr.f32.gmra.mxu0 %v2213_v49  ;;  %1935 = vmatprep.subr.mxu1 %v1027_v22 }
  0x28   :  { %1868 = vmatprep.mubr.f32.mxu0 %v2242_v59 }
  0x29   :  { %1882 = vmatmul.mubr.f32.gmra.mxu1 %v2228_v54 }
  0x2a   :  { %1884 = vmatprep.mubr.f32.mxu1 %v2256_v63 }
  0x2b   :  { %1869 = vmatmul.mubr.f32.gmra.mxu0 %v2244_v60 }
  0x2c   :  { %1891 = vmatprep.mubr.msk.f32.mxu0 %vm52_vm0, %v2117_v9 }
  0x2d   :  { %1885 = vmatmul.mubr.f32.gmra.mxu1 %v2259_v0 }
  0x2e   :  { %1907 = vmatprep.mubr.msk.f32.mxu1 %vm52_vm0, %v2117_v9 }
  0x2f   :  { %1892 = vmatmul.mubr.msk.f32.vlgmr.msra.gmra.mxu0 %vm52_vm0, %v2124_v12 }
  0x30   :  { %1920 = vmatpush3.msra.mxu0 %v2261_v1  ;;  %1894 = vmatprep.mubr.msk.f32.mxu0 %vm52_vm0, %v2140_v17 }
  0x31   :  { %1908 = vmatmul.mubr.msk.f32.vlgmr.msra.gmra.mxu1 %vm52_vm0, %v2124_v12  ;;  %1921 = vmatprep.subr.mxu0 %v2307_v16 }
  0x32   :  { %1936 = vmatpush3.msra.mxu1 %v1027_v22  ;;  %1910 = vmatprep.mubr.msk.f32.mxu1 %vm52_vm0, %v2140_v17 }
  0x33   :  { %1895 = vmatmul.mubr.msk.f32.gmra.mxu0 %vm52_vm0, %v2143_v18  ;;  %1937 = vmatprep.subr.mxu1 %v1034_v4 }
  0x34   :  { %1897 = vmatprep.mubr.msk.f32.mxu0 %vm52_vm0, %v2180_v33  ;;  %1922 = vmatpush3.msra.mxu0 %v2307_v16 }
  0x35   :  { %1911 = vmatmul.mubr.msk.f32.gmra.mxu1 %vm52_vm0, %v2143_v18  ;;  %1951 = vmatprep.subr.mxu0 %v2284_v10 }
  0x36   :  { %1913 = vmatprep.mubr.msk.f32.mxu1 %vm52_vm0, %v2180_v33  ;;  %1938 = vmatpush3.msra.mxu1 %v1034_v4 }
  0x37   :  { %1898 = vmatmul.mubr.msk.f32.gmra.mxu0 %vm52_vm0, %v2200_v43  ;;  %1967 = vmatprep.subr.mxu1 %v2261_v1 }
  0x38   :  { %1900 = vmatprep.mubr.msk.f32.mxu0 %vm52_vm0, %v2222_v52 }
  0x39   :  { %1914 = vmatmul.mubr.msk.f32.gmra.mxu1 %vm52_vm0, %v2200_v43 }
  0x3a   :  { %1916 = vmatprep.mubr.msk.f32.mxu1 %vm52_vm0, %v2222_v52 }
  0x3b   :  { %1901 = vmatmul.mubr.msk.f32.gmra.mxu0 %vm52_vm0, %v2225_v53 }
  0x3c   :  { %1923 = vmatprep.mubr.f32.mxu0 %v2193_v40 }
  0x3d   :  { %1917 = vmatmul.mubr.msk.f32.gmra.mxu1 %vm52_vm0, %v2225_v53 }
  0x3e   :  { %1939 = vmatprep.mubr.msk.f32.mxu1 %vm52_vm0, %v2117_v9 }
  0x3f   :  { %1924 = vmatmul.mubr.f32.vlgmr.msra.gmra.mxu0 %v2202_v44 }
  0x40   :  { %1952 = vmatpush3.msra.mxu0 %v2284_v10  ;;  %1926 = vmatprep.mubr.f32.mxu0 %v2211_v48 }
  0x41   :  { %1940 = vmatmul.mubr.msk.f32.vlgmr.msra.gmra.mxu1 %vm52_vm0, %v2124_v12  ;;  %1953 = vmatprep.subr.mxu0 %v1031_v23 }
  0x42   :  { %1968 = vmatpush3.msra.mxu1 %v2261_v1  ;;  %1942 = vmatprep.mubr.msk.f32.mxu1 %vm52_vm0, %v2140_v17 }
  0x43   :  { %1927 = vmatmul.mubr.f32.gmra.mxu0 %v2216_v50  ;;  %1969 = vmatprep.subr.mxu1 %v2307_v16 }
  0x44   :  { %1929 = vmatprep.mubr.f32.mxu0 %v2253_v62  ;;  %1954 = vmatpush3.msra.mxu0 %v1031_v23 }
  0x45   :  { %1943 = vmatmul.mubr.msk.f32.gmra.mxu1 %vm52_vm0, %v2143_v18  ;;  %1983 = vmatprep.subr.mxu0 %v2295_v11 }
  0x46   :  { %1945 = vmatprep.mubr.msk.f32.mxu1 %vm52_vm0, %v2180_v33  ;;  %1970 = vmatpush3.msra.mxu1 %v2307_v16 }
  0x47   :  { %1930 = vmatmul.mubr.f32.gmra.mxu0 %v2263_v2  ;;  %1999 = vmatprep.subr.mxu1 %v2261_v1 }
  0x48   :  { %1932 = vmatprep.mubr.f32.mxu0 %v2278_v7 }
  0x49   :  { %1946 = vmatmul.mubr.msk.f32.gmra.mxu1 %vm52_vm0, %v2200_v43 }
  0x4a   :  { %1948 = vmatprep.mubr.msk.f32.mxu1 %vm52_vm0, %v2222_v52 }
  0x4b   :  { %1933 = vmatmul.mubr.f32.gmra.mxu0 %v2281_v8 }
  0x4c   :  { %1955 = vmatprep.mubr.f32.mxu0 %v2135_v15 }
  0x4d   :  { %1949 = vmatmul.mubr.msk.f32.gmra.mxu1 %vm52_vm0, %v2225_v53 }
  0x4e   :  { %1971 = vmatprep.mubr.f32.mxu1 %v2160_v24 }
  0x4f   :  { %1956 = vmatmul.mubr.f32.vlgmr.msra.gmra.mxu0 %v2148_v20 }
  0x50   :  { %1984 = vmatpush3.msra.mxu0 %v2295_v11  ;;  %1958 = vmatprep.mubr.f32.mxu0 %v2162_v25 }
  0x51   :  { %1972 = vmatmul.mubr.f32.vlgmr.msra.gmra.mxu1 %v2168_v28  ;;  %1985 = vmatprep.subr.mxu0 %v2325_v3 }
  0x52   :  { %2000 = vmatpush3.msra.mxu1 %v2261_v1  ;;  %1974 = vmatprep.mubr.f32.mxu1 %v2177_v32 }
  0x53   :  { %1959 = vmatmul.mubr.f32.gmra.mxu0 %v2172_v30  ;;  %2001 = vmatprep.subr.mxu1 %v2307_v16 }
  0x54   :  { %1961 = vmatprep.mubr.f32.mxu0 %v2206_v46  ;;  %1986 = vmatpush3.msra.mxu0 %v2325_v3 }
  0x55   :  { %1975 = vmatmul.mubr.f32.gmra.mxu1 %v2185_v37 }
  0x56   :  { %1977 = vmatprep.mubr.f32.mxu1 %v2219_v51  ;;  %2002 = vmatpush3.msra.mxu1 %v2307_v16 }
  0x57   :  { %1962 = vmatmul.mubr.f32.gmra.mxu0 %v2213_v49 }
  0x58   :  { %1964 = vmatprep.mubr.f32.mxu0 %v2242_v59 }
  0x59   :  { %1978 = vmatmul.mubr.f32.gmra.mxu1 %v2228_v54 }
  0x5a   :  { %1980 = vmatprep.mubr.f32.mxu1 %v2256_v63 }
  0x5b   :  { %1965 = vmatmul.mubr.f32.gmra.mxu0 %v2244_v60 }
  0x5c   :  { %1987 = vmatprep.mubr.msk.f32.mxu0 %vm52_vm0, %v2117_v9 }
  0x5d   :  { %1981 = vmatmul.mubr.f32.gmra.mxu1 %v2259_v0 }
  0x5e   :  { %2003 = vmatprep.mubr.msk.f32.mxu1 %vm52_vm0, %v2117_v9 }
  0x5f   :  { %1988 = vmatmul.mubr.msk.f32.vlgmr.msra.gmra.mxu0 %vm52_vm0, %v2124_v12 }
  0x60   :  { %1990 = vmatprep.mubr.msk.f32.mxu0 %vm52_vm0, %v2140_v17 }
  0x61   :  { %2004 = vmatmul.mubr.msk.f32.vlgmr.msra.gmra.mxu1 %vm52_vm0, %v2124_v12 }
  0x62   :  { %2006 = vmatprep.mubr.msk.f32.mxu1 %vm52_vm0, %v2140_v17 }
  0x63   :  { %1991 = vmatmul.mubr.msk.f32.gmra.mxu0 %vm52_vm0, %v2143_v18 }
  0x64   :  { %1993 = vmatprep.mubr.msk.f32.mxu0 %vm52_vm0, %v2180_v33 }
  0x65   :  { %2007 = vmatmul.mubr.msk.f32.gmra.mxu1 %vm52_vm0, %v2143_v18 }
  0x66   :  { %2009 = vmatprep.mubr.msk.f32.mxu1 %vm52_vm0, %v2180_v33 }
  0x67   :  { %1994 = vmatmul.mubr.msk.f32.gmra.mxu0 %vm52_vm0, %v2200_v43 }
  0x68   :  { %1996 = vmatprep.mubr.msk.f32.mxu0 %vm52_vm0, %v2222_v52 }
  0x69   :  { %2010 = vmatmul.mubr.msk.f32.gmra.mxu1 %vm52_vm0, %v2200_v43 }
  0x6a   :  { %2012 = vmatprep.mubr.msk.f32.mxu1 %vm52_vm0, %v2222_v52 }
  0x6b   :  { %1997 = vmatmul.mubr.msk.f32.gmra.mxu0 %vm52_vm0, %v2225_v53 }
  0x6d   :  { %2013 = vmatmul.mubr.msk.f32.gmra.mxu1 %vm52_vm0, %v2225_v53 }
  0xcf   :  { %v1829_v9 = vpop.f32.mrf.mxu0 }
  0xd1   :  { %v150_v12 = vpop.f32.mrf.mxu0  ;;  %v1845_v15 = vpop.f32.mrf.mxu1 }
  0xd2   :  { %v308_v42 = vadd.f32 %v1845_v15, %v1829_v9 }
  0xd3   :  { %v1832_v17 = vpop.f32.mrf.mxu0  ;;  %v301_v18 = vpop.f32.mrf.mxu1 }
  0xd4   :  { %v302_v45 = vadd.f32 %v301_v18, %v150_v12 }
  0xd5   :  { %v170_v20 = vpop.f32.mrf.mxu0  ;;  %v1848_v21 = vpop.f32.mrf.mxu1 }
  0xd6   :  { %v320_v49 = vadd.f32 %v1848_v21, %v1832_v17 }
  0xd7   :  { %v1835_v24 = vpop.f32.mrf.mxu0  ;;  %v313_v25 = vpop.f32.mrf.mxu1 }
  0xd8   :  { %v314_v53 = vadd.f32 %v313_v25, %v170_v20 }
  0xd9   :  { %v190_v26 = vpop.f32.mrf.mxu0  ;;  %v1851_v27 = vpop.f32.mrf.mxu1 }
  0xda   :  { %v332_v58 = vadd.f32 %v1851_v27, %v1835_v24 }
  0xdb   :  { %v1838_v28 = vpop.f32.mrf.mxu0  ;;  %v325_v29 = vpop.f32.mrf.mxu1 }
  0xdc   :  { %v326_v62 = vadd.f32 %v325_v29, %v190_v26 }
  0xdd   :  { %v210_v30 = vpop.f32.mrf.mxu0  ;;  %v1854_v31 = vpop.f32.mrf.mxu1 }
  0xde   :  { %v344_v7 = vadd.f32 %v1854_v31, %v1838_v28 }
  0xdf   :  { %v337_v32 = vpop.f32.mrf.mxu1  ;;  %v1861_v33 = vpop.f32.mrf.mxu0 }
  0xe0   :  { %v427_v46 = vadd.f32 %v1861_v33, %v308_v42  ;;  %v338_v22 = vadd.f32 %v337_v32, %v210_v30 }
  0xe1   :  { %v419_v34 = vpop.f32.mrf.mxu0  ;;  %v1877_v35 = vpop.f32.mrf.mxu1 }
  0xe2   :  { %v420_v50 = vadd.f32 %v419_v34, %v302_v45  ;;  %v552_v54 = vadd.f32 %v1877_v35, %v427_v46 }
  0xe3   :  { %v1864_v36 = vpop.f32.mrf.mxu0  ;;  %v543_v37 = vpop.f32.mrf.mxu1 }
  0xe4   :  { %v441_v55 = vadd.f32 %v1864_v36, %v320_v49  ;;  %v544_v59 = vadd.f32 %v543_v37, %v420_v50 }
  0xe5   :  { %v433_v38 = vpop.f32.mrf.mxu0  ;;  %v1880_v39 = vpop.f32.mrf.mxu1 }
  0xe6   :  { %v434_v60 = vadd.f32 %v433_v38, %v314_v53  ;;  %v568_v1 = vadd.f32 %v1880_v39, %v441_v55 }
  0xe7   :  { %v1867_v40 = vpop.f32.mrf.mxu0  ;;  %v559_v41 = vpop.f32.mrf.mxu1 }
  0xe8   :  { %v455_v2 = vadd.f32 %v1867_v40, %v332_v58  ;;  %v560_v11 = vadd.f32 %v559_v41, %v434_v60 }
  0xe9   :  { %v447_v43 = vpop.f32.mrf.mxu0  ;;  %v1883_v44 = vpop.f32.mrf.mxu1 }
  0xea   :  { %v448_v13 = vadd.f32 %v447_v43, %v326_v62  ;;  %v584_v19 = vadd.f32 %v1883_v44, %v455_v2 }
  0xeb   :  { %v1870_v47 = vpop.f32.mrf.mxu0  ;;  %v575_v48 = vpop.f32.mrf.mxu1 }
  0xec   :  { %v469_v4 = vadd.f32 %v1870_v47, %v344_v7  ;;  %v576_v18 = vadd.f32 %v575_v48, %v448_v13 }
  0xed   :  { %v461_v51 = vpop.f32.mrf.mxu0  ;;  %v1886_v52 = vpop.f32.mrf.mxu1 }
  0xee   :  { %v462_v20 = vadd.f32 %v461_v51, %v338_v22  ;;  %v600_v27 = vadd.f32 %v1886_v52, %v469_v4 }
  0xef   :  { %v591_v56 = vpop.f32.mrf.mxu1  ;;  %v1893_v57 = vpop.f32.mrf.mxu0 }
  0xf0   :  { %v683_v61 = vadd.f32 %v1893_v57, %v552_v54  ;;  %v592_v32 = vadd.f32 %v591_v56, %v462_v20 }
  0xf1   :  { %v676_v63 = vpop.f32.mrf.mxu0  ;;  %v1909_v0 = vpop.f32.mrf.mxu1 }
  0xf2   :  { %v677_v5 = vadd.f32 %v676_v63, %v544_v59  ;;  %v798_v6 = vadd.f32 %v1909_v0, %v683_v61 }
  0xf3   :  { %v1896_v8 = vpop.f32.mrf.mxu0  ;;  %v791_v10 = vpop.f32.mrf.mxu1 }
  0xf4   :  { %838 = vst [vmem:[#allocation2 + $0x8] sm:$0xff] %v798_v6  ;;  %v695_v14 = vadd.f32 %v1896_v8, %v568_v1  ;;  %v792_v16 = vadd.f32 %v791_v10, %v677_v5 }
  0xf5   :  { %v688_v23 = vpop.f32.mrf.mxu0  ;;  %v1912_v3 = vpop.f32.mrf.mxu1 }
  0xf6   :  { %837 = vst [vmem:[#allocation2] sm:$0xff] %v792_v16  ;;  %v689_v9 = vadd.f32 %v688_v23, %v560_v11  ;;  %v810_v12 = vadd.f32 %v1912_v3, %v695_v14 }
  0xf7   :  { %v1899_v15 = vpop.f32.mrf.mxu0  ;;  %v803_v17 = vpop.f32.mrf.mxu1 }
  0xf8   :  { %840 = vst [vmem:[#allocation2 + $0x18] sm:$0xff] %v810_v12  ;;  %v707_v21 = vadd.f32 %v1899_v15, %v584_v19  ;;  %v804_v24 = vadd.f32 %v803_v17, %v689_v9 }
  0xf9   :  { %v700_v25 = vpop.f32.mrf.mxu0  ;;  %v1915_v26 = vpop.f32.mrf.mxu1 }
  0xfa   :  { %839 = vst [vmem:[#allocation2 + $0x10] sm:$0xff] %v804_v24  ;;  %v701_v28 = vadd.f32 %v700_v25, %v576_v18  ;;  %v822_v29 = vadd.f32 %v1915_v26, %v707_v21 }
  0xfb   :  { %v1902_v30 = vpop.f32.mrf.mxu0  ;;  %v815_v31 = vpop.f32.mrf.mxu1 }
  0xfc   :  { %842 = vst [vmem:[#allocation2 + $0x28] sm:$0xff] %v822_v29  ;;  %v719_v33 = vadd.f32 %v1902_v30, %v600_v27  ;;  %v816_v34 = vadd.f32 %v815_v31, %v701_v28 }
  0xfd   :  { %v712_v35 = vpop.f32.mrf.mxu0  ;;  %v1918_v36 = vpop.f32.mrf.mxu1 }
  0xfe   :  { %841 = vst [vmem:[#allocation2 + $0x20] sm:$0xff] %v816_v34  ;;  %v713_v37 = vadd.f32 %v712_v35, %v592_v32  ;;  %v834_v38 = vadd.f32 %v1918_v36, %v719_v33 }
  0xff   :  { %v827_v39 = vpop.f32.mrf.mxu1  ;;  %v1925_v40 = vpop.f32.mrf.mxu0 }
 0x100   :  { %844 = vst [vmem:[#allocation2 + $0x38] sm:$0xff] %v834_v38  ;;  %v828_v41 = vadd.f32 %v827_v39, %v713_v37 }
 0x101   :  { %v920_v42 = vpop.f32.mrf.mxu0  ;;  %v1941_v43 = vpop.f32.mrf.mxu1 }
 0x102   :  { %843 = vst [vmem:[#allocation2 + $0x30] sm:$0xff] %v828_v41 }
 0x103   :  { %v1928_v44 = vpop.f32.mrf.mxu0  ;;  %v1071_v45 = vpop.f32.mrf.mxu1 }
 0x104   :  { %2031 = shalt.err (!%p2028_p4)
}
 0x105   :  { %s2066_s13 = smov 128   ;;  %s2067_s14 = smov 8   ;;  %v940_v46 = vpop.f32.mrf.mxu0  ;;  %v1944_v47 = vpop.f32.mrf.mxu1  ;;  %v1078_v2 = vadd.f32 %v1941_v43, %v1925_v40  ;;  %v1072_v7 = vadd.f32 %v1071_v45, %v920_v42 }
 0x106   :  { %1626 = dma.vmem_to_hbm [thread:$0]  %s1621_s11, 1024, %s2469_s3, [#allocation3], %s2066_s13, %s2066_s13, %s2067_s14   ;;  %v1090_v13 = vadd.f32 %v1944_v47, %v1928_v44 }
 0x107   :  { %v1931_v48 = vpop.f32.mrf.mxu0  ;;  %v1083_v49 = vpop.f32.mrf.mxu1  ;;  %s2068_s3 = smov [#allocation4]  }
 0x108   :  { %v1084_v23 = vadd.f32 %v1083_v49, %v940_v46  ;;  %s1632_s17 = sshll.u32 %s2068_s3, 4  ;;  %s1633_s17 = int_to_ptr.vmem [resolvable:$true] %s1632_s17 }
 0x109   :  { %v960_v50 = vpop.f32.mrf.mxu0  ;;  %v1947_v51 = vpop.f32.mrf.mxu1  ;;  %s2040_s18 = scalar_lea.vmem %s1633_s17, 1024  ;;  %p2045_p6 = scmp.lt.s32.totalorder %s1633_s17, %s1633_s17 }
 0x10a   :  { %v1102_v12 = vadd.f32 %v1947_v51, %v1931_v48  ;;  %p2041_p5 = scmp.ne.s32.totalorder %s1633_s17, %s2040_s18  ;;  %p2046_p7 = scmp.lt.s32.totalorder %s2040_s18, %s2040_s18 }
 0x10b   :  { %v1934_v52 = vpop.f32.mrf.mxu0  ;;  %v1095_v53 = vpop.f32.mrf.mxu1 }
 0x10c   :  { %v1096_v20 = vadd.f32 %v1095_v53, %v960_v50  ;;  %p2047_p8 = por %p2046_p7, %p2045_p6 }
 0x10d   :  { %v980_v54 = vpop.f32.mrf.mxu0  ;;  %v1950_v55 = vpop.f32.mrf.mxu1 }
 0x10e   :  { %v1114_v29 = vadd.f32 %v1950_v55, %v1934_v52  ;;  %p2048_p9 = pnand %p2047_p8, %p2041_p5 }
 0x10f   :  { %v1107_v56 = vpop.f32.mrf.mxu1  ;;  %v1957_v57 = vpop.f32.mrf.mxu0 }
 0x110   :  { %v1197_v8 = vadd.f32 %v1957_v57, %v1078_v2  ;;  %v1108_v36 = vadd.f32 %v1107_v56, %v980_v54 }
 0x111   :  { %v1189_v58 = vpop.f32.mrf.mxu0  ;;  %v1973_v59 = vpop.f32.mrf.mxu1 }
 0x112   :  { %v1190_v14 = vadd.f32 %v1189_v58, %v1072_v7  ;;  %v1322_v3 = vadd.f32 %v1973_v59, %v1197_v8 }
 0x113   :  { %v1960_v60 = vpop.f32.mrf.mxu0  ;;  %v1313_v61 = vpop.f32.mrf.mxu1 }
 0x114   :  { %v1211_v19 = vadd.f32 %v1960_v60, %v1090_v13  ;;  %v1314_v15 = vadd.f32 %v1313_v61, %v1190_v14 }
 0x115   :  { %v1203_v62 = vpop.f32.mrf.mxu0  ;;  %v1976_v63 = vpop.f32.mrf.mxu1 }
 0x116   :  { %v1204_v17 = vadd.f32 %v1203_v62, %v1084_v23  ;;  %v1338_v25 = vadd.f32 %v1976_v63, %v1211_v19 }
 0x117   :  { %v1963_v0 = vpop.f32.mrf.mxu0  ;;  %v1329_v1 = vpop.f32.mrf.mxu1 }
 0x118   :  { %v1225_v26 = vadd.f32 %v1963_v0, %v1102_v12  ;;  %v1330_v32 = vadd.f32 %v1329_v1, %v1204_v17 }
 0x119   :  { %v1217_v5 = vpop.f32.mrf.mxu0  ;;  %v1979_v6 = vpop.f32.mrf.mxu1 }
 0x11a   :  { %v1218_v33 = vadd.f32 %v1217_v5, %v1096_v20  ;;  %v1354_v39 = vadd.f32 %v1979_v6, %v1225_v26 }
 0x11b   :  { %v1966_v10 = vpop.f32.mrf.mxu0  ;;  %v1345_v11 = vpop.f32.mrf.mxu1 }
 0x11c   :  { %v1239_v40 = vadd.f32 %v1966_v10, %v1114_v29  ;;  %v1346_v45 = vadd.f32 %v1345_v11, %v1218_v33 }
 0x11d   :  { %v1231_v16 = vpop.f32.mrf.mxu0  ;;  %v1982_v22 = vpop.f32.mrf.mxu1 }
 0x11e   :  { %v1232_v46 = vadd.f32 %v1231_v16, %v1108_v36  ;;  %v1370_v51 = vadd.f32 %v1982_v22, %v1239_v40 }
 0x11f   :  { %v1361_v4 = vpop.f32.mrf.mxu1  ;;  %v1989_v9 = vpop.f32.mrf.mxu0 }
 0x120   :  { %v1453_v18 = vadd.f32 %v1989_v9, %v1322_v3  ;;  %v1362_v56 = vadd.f32 %v1361_v4, %v1232_v46 }
 0x121   :  { %v1446_v21 = vpop.f32.mrf.mxu0  ;;  %v2005_v24 = vpop.f32.mrf.mxu1 }
 0x122   :  { %v1447_v27 = vadd.f32 %v1446_v21, %v1314_v15  ;;  %v1568_v28 = vadd.f32 %v2005_v24, %v1453_v18 }
 0x123   :  { %v1992_v30 = vpop.f32.mrf.mxu0  ;;  %v1561_v31 = vpop.f32.mrf.mxu1 }
 0x124   :  { %1608 = vst [vmem:[#allocation4 + $0x8] sm:$0xff] %v1568_v28  ;;  %v1465_v34 = vadd.f32 %v1992_v30, %v1338_v25  ;;  %v1562_v35 = vadd.f32 %v1561_v31, %v1447_v27 }
 0x125   :  { %v1458_v37 = vpop.f32.mrf.mxu0  ;;  %v2008_v38 = vpop.f32.mrf.mxu1 }
 0x126   :  { %1607 = vst [vmem:[#allocation4] sm:$0xff] %v1562_v35  ;;  %v1459_v41 = vadd.f32 %v1458_v37, %v1330_v32  ;;  %v1580_v42 = vadd.f32 %v2008_v38, %v1465_v34 }
 0x127   :  { %v1995_v43 = vpop.f32.mrf.mxu0  ;;  %v1573_v44 = vpop.f32.mrf.mxu1 }
 0x128   :  { %1610 = vst [vmem:[#allocation4 + $0x18] sm:$0xff] %v1580_v42  ;;  %v1477_v47 = vadd.f32 %v1995_v43, %v1354_v39  ;;  %v1574_v48 = vadd.f32 %v1573_v44, %v1459_v41 }
 0x129   :  { %v1470_v49 = vpop.f32.mrf.mxu0  ;;  %v2011_v50 = vpop.f32.mrf.mxu1 }
 0x12a   :  { %1609 = vst [vmem:[#allocation4 + $0x10] sm:$0xff] %v1574_v48  ;;  %v1471_v52 = vadd.f32 %v1470_v49, %v1346_v45  ;;  %v1592_v53 = vadd.f32 %v2011_v50, %v1477_v47 }
 0x12b   :  { %v1998_v54 = vpop.f32.mrf.mxu0  ;;  %v1585_v55 = vpop.f32.mrf.mxu1 }
 0x12c   :  { %1612 = vst [vmem:[#allocation4 + $0x28] sm:$0xff] %v1592_v53  ;;  %v1489_v57 = vadd.f32 %v1998_v54, %v1370_v51  ;;  %v1586_v58 = vadd.f32 %v1585_v55, %v1471_v52 }
 0x12d   :  { %v1482_v59 = vpop.f32.mrf.mxu0  ;;  %v2014_v60 = vpop.f32.mrf.mxu1 }
 0x12e   :  { %1611 = vst [vmem:[#allocation4 + $0x20] sm:$0xff] %v1586_v58  ;;  %v1483_v61 = vadd.f32 %v1482_v59, %v1362_v56  ;;  %v1604_v62 = vadd.f32 %v2014_v60, %v1489_v57 }
 0x12f   :  { %v1597_v63 = vpop.f32.mrf.mxu1 }
 0x130   :  { %1614 = vst [vmem:[#allocation4 + $0x38] sm:$0xff] %v1604_v62  ;;  %v1598_v0 = vadd.f32 %v1597_v63, %v1483_v61 }
 0x132   :  { %1613 = vst [vmem:[#allocation4 + $0x30] sm:$0xff] %v1598_v0 }
 0x133   :  { %2051 = shalt.err (!%p2048_p9)
}
 0x134   :  { %1638 = dma.vmem_to_hbm [thread:$0]  %s1633_s17, 1024, %s2470_s4, [#allocation5], %s2066_s13, %s2066_s13, %s2067_s14  }
 0x135   :  { %2060 = dma.done.wait [#allocation3], 1024  }
 0x136   :  { %2061 = vsyncadd [#allocation3], 4294966272 }
 0x137   :  { %2062 = dma.done.wait [#allocation5], 1024  }
 0x138   :  { %2063 = vsyncadd [#allocation5], 4294966272 }
 0x139   :  { %1645 = vsyncpa [#allocation3], 1 }
 0x13a   :  { %1646 = vsyncpa [#allocation5], 1 }

</bundles_post_ra>
